<compile_context>
chip_gen: v6e
topology: v6e:2x2x1
jax: 0.10.0
libtpu: 0.0.40
codegen_flags: <defaults>
</compile_context>

<pallas_src>
import functools

import jax
import jax.numpy as jnp
from jax import lax
from jax.experimental import pallas as pl
from jax.experimental.pallas import tpu as pltpu


def _round_up(x, m):
    return ((x + m - 1) // m) * m


def _opl_block_kernel(f_ref, lab_ref, csum_ref, cnt_ref, trace_ref, *,
                      normalize, num_classes):
    """Accumulate class sums / class counts / trace for one batch block.

    f_ref    : (tb, D)  feature rows of this block (input dtype)
    lab_ref  : (1, tb)  int32 labels (-1 for padded rows)
    csum_ref : (C, D)   f32  += per-class sum of (normalized) feature rows
    cnt_ref  : (C, 1)   f32  += per-class row counts
    trace_ref: (1, 1)   f32  += sum_i ||f_i||^2 (of normalized rows if requested)
    """
    j = pl.program_id(1)

    # Output blocks are indexed by the parallel axis only -> resident in VMEM
    # across the whole j (reduction) sweep; init them on the first j step.
    @pl.when(j == 0)
    def _init():
        csum_ref[...] = jnp.zeros_like(csum_ref)
        cnt_ref[...] = jnp.zeros_like(cnt_ref)
        trace_ref[...] = jnp.zeros_like(trace_ref)

    f = f_ref[...].astype(jnp.float32)                      # (tb, D)
    sq = jnp.sum(f * f, axis=1, keepdims=True)              # (tb, 1)
    if normalize:
        # F.normalize(p=2, dim=1): v / max(||v||, 1e-12)
        #   == v * rsqrt(max(||v||^2, 1e-24))   (EUP rsqrt, no full-tile divide)
        inv = lax.rsqrt(jnp.maximum(sq, 1e-24))
        f = f * inv
        row_sq = sq * (inv * inv)     # ||f_norm||^2; exactly 0 for zero/padded rows
    else:
        row_sq = sq

    # One-hot of the block labels, (C, tb). Padded labels (-1) match nothing,
    # so padded rows add nothing to class sums or counts.
    lab = lab_ref[...]                                               # (1, tb)
    cls = lax.broadcasted_iota(jnp.int32, (num_classes, lab.shape[1]), 0)
    onehot = (cls == lab).astype(jnp.float32)                        # (C, tb)

    # Per-class feature sums on the MXU: (C, tb) @ (tb, D) -> (C, D), f32 acc.
    csum_ref[...] += lax.dot_general(
        onehot, f,
        dimension_numbers=(((1,), (0,)), ((), ())),
        preferred_element_type=jnp.float32)

    cnt_ref[...] += jnp.sum(onehot, axis=1, keepdims=True)           # (C, 1)
    trace_ref[...] += jnp.sum(row_sq, axis=0, keepdims=True)         # (1, 1)


def orthogonal_projection_loss(features, labels, gamma=0.5, normalize=True,
                               num_classes=None, block_b=256):
    """Pallas implementation of OrthogonalProjectionLoss.forward.

    features: [B, D] float array; labels: [B] int array with values in
    [0, num_classes). Returns the scalar f32 loss.

    num_classes: static bound on label values + 1 (needed to size the one-hot
      / class-sum accumulators). If None it is taken from the concrete labels
      (i.e. only works outside jit).
    block_b: batch tile; must be a multiple of 128 when B > block_b.
    """
    B, D = features.shape
    labels = labels.astype(jnp.int32)

    if num_classes is None:
        num_classes = int(jax.device_get(jnp.max(labels))) + 1
    C = max(int(num_classes), 1)
    C_pad = _round_up(C, 8)           # layout-friendly; extra classes stay zero

    # ---- batch tiling: (parallel shards) x (reduction blocks) -----------------
    tb = int(block_b)
    if B <= tb:
        # Single block, unless splitting still leaves >=128 rows per block —
        # then use two blocks so the parallel axis can feed both v7x TCs.
        tb = 128 if B > 128 else _round_up(B, 8)
    if B > tb and tb % 128 != 0:
        raise ValueError("block_b must be a multiple of 128 when B > block_b")
    nb = -(-B // tb)                  # cdiv
    B_pad = nb * tb
    n_par = 2 if (nb >= 2 and nb % 2 == 0) else 1
    n_red = nb // n_par

    feats, labs = features, labels
    if B_pad != B:
        # Padded feature rows are zero and padded labels are -1, so they
        # contribute nothing to class sums, counts or the trace.
        feats = jnp.pad(features, ((0, B_pad - B), (0, 0)))
        labs = jnp.pad(labels, (0, B_pad - B), constant_values=-1)
    labs = labs.reshape(1, B_pad)

    # ---- VMEM budget: actual working set, with headroom under the chip cap ----
    itemsize = jnp.dtype(features.dtype).itemsize
    vmem_est = (2 * tb * D * itemsize      # double-buffered feature block
                + tb * D * 4               # f32 normalized copy
                + C_pad * tb * 4           # one-hot tile
                + 2 * C_pad * D * 4        # class-sum accumulator (+writeback)
                + 2 * 1024 * 1024)         # slack for small refs / internals
    try:
        vmem_cap = pltpu.get_tpu_info().vmem_capacity_bytes
    except Exception:                      # pragma: no cover - older runtimes
        vmem_cap = 64 * 1024 * 1024
    vmem_limit = int(min(max(2 * vmem_est, 32 * 1024 * 1024),
                         int(0.85 * vmem_cap)))

    kernel = functools.partial(_opl_block_kernel, normalize=normalize,
                               num_classes=C_pad)

    csum, cnt, trace = pl.pallas_call(
        kernel,
        grid=(n_par, n_red),   # (parallel shard, batch-block reduction)
        in_specs=[
            pl.BlockSpec((tb, D), lambda i, j: (i * n_red + j, 0)),   # features
            pl.BlockSpec((1, tb), lambda i, j: (0, i * n_red + j)),   # labels
        ],
        out_specs=[
            pl.BlockSpec((None, C_pad, D), lambda i, j: (i, 0, 0)),   # class sums
            pl.BlockSpec((None, C_pad, 1), lambda i, j: (i, 0, 0)),   # class counts
            pl.BlockSpec((None, 1, 1), lambda i, j: (i, 0, 0)),       # trace
        ],
        out_shape=[
            jax.ShapeDtypeStruct((n_par, C_pad, D), jnp.float32),
            jax.ShapeDtypeStruct((n_par, C_pad, 1), jnp.float32),
            jax.ShapeDtypeStruct((n_par, 1, 1), jnp.float32),
        ],
        compiler_params=pltpu.CompilerParams(
            dimension_semantics=("parallel", "arbitrary"),
            vmem_limit_bytes=vmem_limit,
        ),
    )(feats, labs)

    # ---- tiny O(C*D) epilogue in plain XLA (no B x B anywhere) ----------------
    class_sums = jnp.sum(csum, axis=0)              # (C_pad, D)
    counts = jnp.sum(cnt, axis=0)[:, 0]             # (C_pad,)
    tr = jnp.sum(trace)                             # sum_i <f_i, f_i>

    total = jnp.sum(class_sums, axis=0)             # sum_i f_i
    sum_all = jnp.sum(total * total)                # all pairs incl. diagonal
    sum_same = jnp.sum(class_sums * class_sums)     # same-label pairs incl. diag

    same_count = jnp.sum(counts * counts)           # sum_c n_c^2
    n_pos = same_count - B                          # same-label pairs, no diagonal
    n_neg = float(B) * float(B) - same_count        # different-label pairs

    pos_pairs_mean = (sum_same - tr) / (n_pos + 1e-6)
    neg_pairs_mean = (sum_all - sum_same) / (n_neg + 1e-6)
    return 1.0 - pos_pairs_mean + gamma * neg_pairs_mean


def _reference_loss(features, labels, gamma=0.5, normalize=True):
    # Pure-JAX reference mirroring the PyTorch module.
    f = features.astype(jnp.float32)
    if normalize:
        n = jnp.sqrt(jnp.sum(f * f, axis=1, keepdims=True))
        f = f / jnp.maximum(n, 1e-12)
    lab = labels[:, None]
    mask = lab == lab.T
    eye = jnp.eye(mask.shape[0], dtype=bool)
    mask_pos = jnp.where(mask & ~eye, 1.0, 0.0)
    mask_neg = jnp.where(~mask, 1.0, 0.0)
    dot = jnp.matmul(f, f.T, precision=jax.lax.Precision.HIGHEST)
    pos = jnp.sum(mask_pos * dot) / (jnp.sum(mask_pos) + 1e-6)
    neg = jnp.sum(mask_neg * dot) / (jnp.sum(mask_neg) + 1e-6)
    return 1.0 - pos + gamma * neg


if __name__ == "__main__":
    key = jax.random.PRNGKey(0)
    kf, kl, kf2, kl2, kf3, kl3 = jax.random.split(key, 6)

    # Small single-block case (grid (1, 1)), typical module use.
    B, D = 8, 32
    features = jax.random.normal(kf, (B, D), dtype=jnp.float32)
    labels = jax.random.randint(kl, (B,), 0, 3, dtype=jnp.int32)
    loss = orthogonal_projection_loss(features, labels, gamma=0.5,
                                      normalize=True, num_classes=3)
    loss = jax.block_until_ready(loss)
    ref = _reference_loss(features, labels, gamma=0.5, normalize=True)
    assert jnp.allclose(loss, ref, atol=5e-5, rtol=5e-5), (loss, ref)

    # Multi-block reduction case (grid (1, 3)): odd block count -> one shard.
    B2, D2 = 384, 64
    features2 = jax.random.normal(kf2, (B2, D2), dtype=jnp.float32)
    labels2 = jax.random.randint(kl2, (B2,), 0, 7, dtype=jnp.int32)
    loss2 = orthogonal_projection_loss(features2, labels2, gamma=0.5,
                                       normalize=True, num_classes=7,
                                       block_b=128)
    loss2 = jax.block_until_ready(loss2)
    ref2 = _reference_loss(features2, labels2, gamma=0.5, normalize=True)
    assert jnp.allclose(loss2, ref2, atol=5e-5, rtol=5e-5), (loss2, ref2)

    # Megacore-parallel case (grid (2, 1)) with padding (250 -> 256) and
    # normalize=False to exercise that path too.
    B3, D3 = 250, 64
    features3 = jax.random.normal(kf3, (B3, D3), dtype=jnp.float32) * 0.1
    labels3 = jax.random.randint(kl3, (B3,), 0, 5, dtype=jnp.int32)
    loss3 = orthogonal_projection_loss(features3, labels3, gamma=0.5,
                                       normalize=False, num_classes=5)
    loss3 = jax.block_until_ready(loss3)
    ref3 = _reference_loss(features3, labels3, gamma=0.5, normalize=False)
    assert jnp.allclose(loss3, ref3, atol=5e-5, rtol=5e-5), (loss3, ref3)

    print("KERNEL_OK")
</pallas_src>

<mosaic_0001>
module attributes {stable_mosaic.version = 11 : i64} {
  func.func @_opl_block_kernel(%arg0: i32, %arg1: i32, %arg2: memref<8x32xf32, #tpu.memory_space<vmem>>, %arg3: memref<1x8xi32, #tpu.memory_space<vmem>>, %arg4: memref<1x8x32xf32, #tpu.memory_space<vmem>>, %arg5: memref<1x8x1xf32, #tpu.memory_space<vmem>>, %arg6: memref<1x1x1xf32, #tpu.memory_space<vmem>>) attributes {dimension_semantics = [#tpu.dimension_semantics<parallel>, #tpu.dimension_semantics<arbitrary>], iteration_bounds = array<i64: 1, 1>, scalar_prefetch = 0 : i64, scratch_operands = 0 : i64, tpu.core_type = #tpu.core_type<tc>, window_params = [{transform_indices = @transform_0, window_bounds = array<i64: 8, 32>}, {transform_indices = @transform_1, window_bounds = array<i64: 1, 8>}, {transform_indices = @transform_2, window_bounds = array<i64: 1, 8, 32>}, {transform_indices = @transform_3, window_bounds = array<i64: 1, 8, 1>}, {transform_indices = @transform_4, window_bounds = array<i64: 1, 1, 1>}]} {
    %c0_i32 = arith.constant 0 : i32
    %0 = arith.cmpi eq, %arg1, %c0_i32 : i32
    %1 = arith.extui %0 : i1 to i32
    %c0_i32_0 = arith.constant 0 : i32
    %2 = arith.cmpi ne, %1, %c0_i32_0 : i32
    scf.if %2 {
      %cst_26 = arith.constant 0.000000e+00 : f32
      %43 = vector.broadcast %cst_26 : f32 to vector<8x32xf32>
      %c0_27 = arith.constant 0 : index
      %c0_28 = arith.constant 0 : index
      %c0_29 = arith.constant 0 : index
      %44 = vector.load %arg4[%c0_27, %c0_28, %c0_29] : memref<1x8x32xf32, #tpu.memory_space<vmem>>, vector<1x8x32xf32>
      %45 = vector.shape_cast %44 : vector<1x8x32xf32> to vector<8x32xf32>
      %46 = vector.shape_cast %43 : vector<8x32xf32> to vector<1x8x32xf32>
      tpu.vector_store %arg4[%c0_27, %c0_28, %c0_29], %46 {strides = array<i32>} : memref<1x8x32xf32, #tpu.memory_space<vmem>>, vector<1x8x32xf32>,
      %cst_30 = arith.constant 0.000000e+00 : f32
      %47 = vector.broadcast %cst_30 : f32 to vector<8x1xf32>
      %c0_31 = arith.constant 0 : index
      %c0_32 = arith.constant 0 : index
      %c0_33 = arith.constant 0 : index
      %48 = vector.load %arg5[%c0_31, %c0_32, %c0_33] : memref<1x8x1xf32, #tpu.memory_space<vmem>>, vector<1x8x1xf32>
      %49 = vector.shape_cast %48 : vector<1x8x1xf32> to vector<8x1xf32>
      %50 = vector.shape_cast %47 : vector<8x1xf32> to vector<1x8x1xf32>
      tpu.vector_store %arg5[%c0_31, %c0_32, %c0_33], %50 {strides = array<i32>} : memref<1x8x1xf32, #tpu.memory_space<vmem>>, vector<1x8x1xf32>,
      %cst_34 = arith.constant 0.000000e+00 : f32
      %51 = vector.broadcast %cst_34 : f32 to vector<1x1xf32>
      %c0_35 = arith.constant 0 : index
      %c0_36 = arith.constant 0 : index
      %c0_37 = arith.constant 0 : index
      %52 = vector.load %arg6[%c0_35, %c0_36, %c0_37] : memref<1x1x1xf32, #tpu.memory_space<vmem>>, vector<1x1x1xf32>
      %53 = vector.shape_cast %52 : vector<1x1x1xf32> to vector<1x1xf32>
      %54 = vector.shape_cast %51 : vector<1x1xf32> to vector<1x1x1xf32>
      tpu.vector_store %arg6[%c0_35, %c0_36, %c0_37], %54 {strides = array<i32>} : memref<1x1x1xf32, #tpu.memory_space<vmem>>, vector<1x1x1xf32>,
    } else {
    }
    %c0 = arith.constant 0 : index
    %c0_1 = arith.constant 0 : index
    %3 = vector.load %arg2[%c0, %c0_1] : memref<8x32xf32, #tpu.memory_space<vmem>>, vector<8x32xf32>
    %4 = arith.mulf %3, %3 : vector<8x32xf32>
    %cst = arith.constant dense<0.000000e+00> : vector<8xf32>
    %5 = vector.multi_reduction <add>, %4, %cst [1] : vector<8x32xf32> to vector<8xf32>
    %6 = vector.shape_cast %5 : vector<8xf32> to vector<8x1xf32>
    %cst_2 = arith.constant 1.000000e-24 : f32
    %7 = vector.broadcast %cst_2 : f32 to vector<8x1xf32>
    %8 = arith.maximumf %6, %7 : vector<8x1xf32>
    %9 = math.rsqrt %8 : vector<8x1xf32>
    %10 = vector.broadcast %9 : vector<8x1xf32> to vector<8x32xf32>
    %11 = arith.mulf %3, %10 : vector<8x32xf32>
    %12 = arith.mulf %9, %9 : vector<8x1xf32>
    %13 = arith.mulf %6, %12 : vector<8x1xf32>
    %c0_3 = arith.constant 0 : index
    %c0_4 = arith.constant 0 : index
    %14 = vector.load %arg3[%c0_3, %c0_4] : memref<1x8xi32, #tpu.memory_space<vmem>>, vector<1x8xi32>
    %15 = tpu.iota {dimensions = array<i32: 0>} : vector<8x8xi32>
    %16 = vector.broadcast %14 : vector<1x8xi32> to vector<8x8xi32>
    %17 = arith.cmpi eq, %15, %16 : vector<8x8xi32>
    %18 = arith.extui %17 : vector<8x8xi1> to vector<8x8xi32>
    %19 = arith.sitofp %18 : vector<8x8xi32> to vector<8x8xf32>
    %c0_5 = arith.constant 0 : index
    %c0_6 = arith.constant 0 : index
    %c0_7 = arith.constant 0 : index
    %20 = vector.load %arg4[%c0_5, %c0_6, %c0_7] : memref<1x8x32xf32, #tpu.memory_space<vmem>>, vector<1x8x32xf32>
    %21 = vector.shape_cast %20 : vector<1x8x32xf32> to vector<8x32xf32>
    %cst_8 = arith.constant dense<0.000000e+00> : vector<8x32xf32>
    %22 = tpu.matmul %19, %11, %cst_8 {dimension_numbers = #tpu.dot_dimension_numbers<[1], [0], [0], [1], [0, 0, 1, 1], [], []>} : vector<8x8xf32>, vector<8x32xf32>, vector<8x32xf32> -> vector<8x32xf32>
    %23 = arith.addf %21, %22 : vector<8x32xf32>
    %c0_9 = arith.constant 0 : index
    %c0_10 = arith.constant 0 : index
    %c0_11 = arith.constant 0 : index
    %24 = vector.load %arg4[%c0_9, %c0_10, %c0_11] : memref<1x8x32xf32, #tpu.memory_space<vmem>>, vector<1x8x32xf32>
    %25 = vector.shape_cast %24 : vector<1x8x32xf32> to vector<8x32xf32>
    %26 = vector.shape_cast %23 : vector<8x32xf32> to vector<1x8x32xf32>
    tpu.vector_store %arg4[%c0_9, %c0_10, %c0_11], %26 {strides = array<i32>} : memref<1x8x32xf32, #tpu.memory_space<vmem>>, vector<1x8x32xf32>,
    %c0_12 = arith.constant 0 : index
    %c0_13 = arith.constant 0 : index
    %c0_14 = arith.constant 0 : index
    %27 = vector.load %arg5[%c0_12, %c0_13, %c0_14] : memref<1x8x1xf32, #tpu.memory_space<vmem>>, vector<1x8x1xf32>
    %28 = vector.shape_cast %27 : vector<1x8x1xf32> to vector<8x1xf32>
    %cst_15 = arith.constant dense<0.000000e+00> : vector<8xf32>
    %29 = vector.multi_reduction <add>, %19, %cst_15 [1] : vector<8x8xf32> to vector<8xf32>
    %30 = vector.shape_cast %29 : vector<8xf32> to vector<8x1xf32>
    %31 = arith.addf %28, %30 : vector<8x1xf32>
    %c0_16 = arith.constant 0 : index
    %c0_17 = arith.constant 0 : index
    %c0_18 = arith.constant 0 : index
    %32 = vector.load %arg5[%c0_16, %c0_17, %c0_18] : memref<1x8x1xf32, #tpu.memory_space<vmem>>, vector<1x8x1xf32>
    %33 = vector.shape_cast %32 : vector<1x8x1xf32> to vector<8x1xf32>
    %34 = vector.shape_cast %31 : vector<8x1xf32> to vector<1x8x1xf32>
    tpu.vector_store %arg5[%c0_16, %c0_17, %c0_18], %34 {strides = array<i32>} : memref<1x8x1xf32, #tpu.memory_space<vmem>>, vector<1x8x1xf32>,
    %c0_19 = arith.constant 0 : index
    %c0_20 = arith.constant 0 : index
    %c0_21 = arith.constant 0 : index
    %35 = vector.load %arg6[%c0_19, %c0_20, %c0_21] : memref<1x1x1xf32, #tpu.memory_space<vmem>>, vector<1x1x1xf32>
    %36 = vector.shape_cast %35 : vector<1x1x1xf32> to vector<1x1xf32>
    %cst_22 = arith.constant dense<0.000000e+00> : vector<1xf32>
    %37 = vector.multi_reduction <add>, %13, %cst_22 [0] : vector<8x1xf32> to vector<1xf32>
    %38 = vector.shape_cast %37 : vector<1xf32> to vector<1x1xf32>
    %39 = arith.addf %36, %38 : vector<1x1xf32>
    %c0_23 = arith.constant 0 : index
    %c0_24 = arith.constant 0 : index
    %c0_25 = arith.constant 0 : index
    %40 = vector.load %arg6[%c0_23, %c0_24, %c0_25] : memref<1x1x1xf32, #tpu.memory_space<vmem>>, vector<1x1x1xf32>
    %41 = vector.shape_cast %40 : vector<1x1x1xf32> to vector<1x1xf32>
    %42 = vector.shape_cast %39 : vector<1x1xf32> to vector<1x1x1xf32>
    tpu.vector_store %arg6[%c0_23, %c0_24, %c0_25], %42 {strides = array<i32>} : memref<1x1x1xf32, #tpu.memory_space<vmem>>, vector<1x1x1xf32>,
    return
  }
  func.func @transform_0(%arg0: i32, %arg1: i32) -> (i32, i32) {
    %c1_i32 = arith.constant 1 : i32
    %0 = arith.muli %arg0, %c1_i32 : i32
    %1 = arith.addi %0, %arg1 : i32
    %c0_i32 = arith.constant 0 : i32
    %c0_i32_0 = arith.constant 0 : i32
    return %1, %c0_i32 : i32, i32
  }
  func.func @transform_1(%arg0: i32, %arg1: i32) -> (i32, i32) {
    %c1_i32 = arith.constant 1 : i32
    %0 = arith.muli %arg0, %c1_i32 : i32
    %1 = arith.addi %0, %arg1 : i32
    %c0_i32 = arith.constant 0 : i32
    %c0_i32_0 = arith.constant 0 : i32
    return %c0_i32, %1 : i32, i32
  }
  func.func @transform_2(%arg0: i32, %arg1: i32) -> (i32, i32, i32) {
    %c0_i32 = arith.constant 0 : i32
    %c0_i32_0 = arith.constant 0 : i32
    %c0_i32_1 = arith.constant 0 : i32
    return %arg0, %c0_i32, %c0_i32_0 : i32, i32, i32
  }
  func.func @transform_3(%arg0: i32, %arg1: i32) -> (i32, i32, i32) {
    %c0_i32 = arith.constant 0 : i32
    %c0_i32_0 = arith.constant 0 : i32
    %c0_i32_1 = arith.constant 0 : i32
    return %arg0, %c0_i32, %c0_i32_0 : i32, i32, i32
  }
  func.func @transform_4(%arg0: i32, %arg1: i32) -> (i32, i32, i32) {
    %c0_i32 = arith.constant 0 : i32
    %c0_i32_0 = arith.constant 0 : i32
    %c0_i32_1 = arith.constant 0 : i32
    return %arg0, %c0_i32, %c0_i32_0 : i32, i32, i32
  }
}

</mosaic_0001>

<bundles_post_ra>
// kernel: tpu_custom_call.1
= control target key start
LH: loop header
LB: loop body
LE: loop exit
PB: predicated region body
PF: predicated region fallthrough
CT: control target
= control target key end

     0   :  { %10 = vsyncpa [#allocation3], 0  ;;  %s346_s0 = inlined_call_operand.hbm [shape: f32[8,32], index: 0, kind: input, shape index: {}]   ;;  %s347_s1 = inlined_call_operand.vmem [shape: s32[1,8], index: 1, kind: input, shape index: {}]   ;;  %s348_s2 = inlined_call_operand.hbm [shape: f32[1,8,32], index: 2, kind: output, shape index: {0}]   ;;  %s349_s3 = inlined_call_operand.vmem [shape: f32[1,8,1], index: 3, kind: output, shape index: {1}]   ;;  %s350_s4 = inlined_call_operand.hbm [shape: f32[1,1,1], index: 4, kind: output, shape index: {2}]  }
   0x1   :  { %11 = vsyncpa [#allocation4], 0 }
   0x2   :  { %12 = vsyncpa [#allocation7], 0  ;;  %s290_s15 = smov [#allocation2]  }
   0x3   :  { %s22_s16 = sshll.u32 %s290_s15, 4  ;;  %s23_s16 = int_to_ptr.vmem [resolvable:$true] %s22_s16 }
   0x4   :  { %s232_s17 = scalar_lea.vmem %s23_s16, 128  ;;  %p237_p1 = scmp.lt.s32.totalorder %s23_s16, %s23_s16 }
   0x5   :  { %p233_p0 = scmp.ne.s32.totalorder %s23_s16, %s232_s17  ;;  %p238_p2 = scmp.lt.s32.totalorder %s232_s17, %s232_s17 }
   0x7   :  { %p239_p3 = por %p238_p2, %p237_p1 }
   0x9   :  { %p240_p4 = pnand %p239_p3, %p233_p0 }
   0xb   :  { %243 = shalt.err (!%p240_p4)
}
   0xc   :  { %25 = dma.hbm_to_vmem [thread:$0]  %s346_s0, 128, %s23_s16, [#allocation3]  }
   0xd   :  { %284 = dma.done.wait [#allocation3], 128  }
   0xe   :  { %285 = vsyncadd [#allocation3], 4294967168  ;;  %vm50_vm0 = vcmask 261120   ;;  %v291_v0 = vmov 0.0   ;;  %v56_v1 = vld [vmem:[#allocation2] sm:$0xff]  ;;  %vm292_vm1 = vmmov 0   ;;  %v68_v4 = vlaneseq }
   0xf   :  { %51 = vst.msk [vmem:[#allocation5] sm:$0xff] %vm50_vm0, %v291_v0  ;;  %212 = vmatprep.subr.mxu0 %v291_v0  ;;  %v57_v2 = vmul.f32 %v56_v1, %v56_v1  ;;  %214 = vmatprep.mubr.msk.f32.mxu0 %vm292_vm1, %v291_v0  ;;  %v207_v6 = vld [vmem:[%s347_s1] ss:$0 sm:$0xff]  ;;  %vm54_vm2 = vcmask 0   ;;  %vm78_vm4 = vcmask 64512   ;;  %vm52_vm5 = vcmask 7168  }
  0x10   :  { %v69_v5 = vshrl.u32 %v68_v4, 7  ;;  %55 = vst.msk [vmem:[#allocation6] sm:$0x1] %vm54_vm2, %v291_v0  ;;  %s293_s24 = smov [#allocation6]  }
  0x11   :  { %v59_v3 = vsel %vm50_vm0, %v57_v2, 0.0  ;;  %53 = vst.msk [vmem:[%s349_s3] sm:$0xff] %vm52_vm5, %v291_v0  ;;  %s189_s25 = sshll.u32 %s293_s24, 4  ;;  %s190_s25 = int_to_ptr.vmem [resolvable:$true] %s189_s25 }
  0x12   :  { %60 = vadd.xlane.f32.xlu0 %v59_v3  ;;  %vm74_vm3 = vcmp.eq.s32.totalorder %v69_v5, %v207_v6  ;;  %s244_s28 = scalar_lea.vmem %s190_s25, 16  ;;  %s248_s29 = scalar_lea.vmem %s190_s25, 32 }
  0x13   :  { %v208_v7 = vsel %vm74_vm3, 1.0, %v291_v0  ;;  %p245_p5 = scmp.ne.s32.totalorder %s190_s25, %s244_s28  ;;  %p249_p6 = scmp.lt.s32.totalorder %s190_s25, %s190_s25 }
  0x14   :  { %v155_v8 = vsel %vm78_vm4, %v208_v7, 0.0  ;;  %p250_p7 = scmp.lt.s32.totalorder %s248_s29, %s244_s28 }
  0x16   :  { %156 = vadd.xlane.f32.xlu0 %v155_v8  ;;  %p251_p8 = por %p250_p7, %p249_p6 }
  0x17   :  { %v161_v20 = vld [vmem:[#allocation6] sm:$0x1] }
  0x18   :  { %v154_v24 = vld [vmem:[%s349_s3] sm:$0xff]  ;;  %p252_p9 = pnand %p251_p8, %p245_p5 }
  0x9b   :  { %v61_v9 = vpop.xlane.xlu0 %60 }
  0x9c   :  { %v62_v10 = vmax.f32 %v61_v9, 1e-24 }
  0x9e   :  { %222 = vrsqrt.f32 %v62_v10 }
  0x9f   :  { %v157_v23 = vpop.xlane.xlu0 %156 }
  0xa0   :  { %v158_v25 = vadd.f32 %v157_v23, %v154_v24 }
  0xa2   :  { %160 = vst.msk [vmem:[%s349_s3] sm:$0xff] %vm52_vm5, %v158_v25 }
  0xab   :  { %v223_v11 = vpop.eup %222 }
  0xac   :  { %v65_v12 = vmul.f32 %v223_v11, %v223_v11  ;;  %v64_v13 = vmul.f32 %v223_v11, %v56_v1 }
  0xae   :  { %v66_v14 = vmul.f32 %v65_v12, %v61_v9  ;;  %213 = vmatpush3.msra.mxu0 %v64_v13 }
  0xaf   :  { %215 = vmatmul.mubr.msk.f32.vlgmr.msra.gmra.mxu0 %vm78_vm4, %v208_v7 }
  0xb0   :  { %v162_v15 = vrot.slane %v66_v14, 4 }
  0xb2   :  { %v163_v16 = vadd.f32 %v162_v15, %v66_v14 }
  0xb4   :  { %v164_v17 = vrot.slane %v163_v16, 2 }
  0xb6   :  { %v165_v18 = vadd.f32 %v164_v17, %v163_v16 }
  0xb8   :  { %v166_v19 = vrot.slane %v165_v18, 1 }
  0xba   :  { %v167_v21 = vadd.f32 %v166_v19, %v165_v18 }
  0xbc   :  { %v168_v22 = vadd.f32 %v167_v21, %v161_v20 }
  0xbe   :  { %170 = vst.msk [vmem:[#allocation6] sm:$0x1] %vm54_vm2, %v168_v22 }
  0xbf   :  { %255 = shalt.err (!%p252_p9)
}
  0xc0   :  { %192 = dma.vmem_to_hbm [thread:$0]  %s190_s25, 16, %s350_s4, [#allocation7]   ;;  %v77_v26 = vld [vmem:[#allocation5] sm:$0xff] }
  0xc1   :  { %s294_s6 = smov [#allocation5]  }
  0xc2   :  { %s177_s7 = sshll.u32 %s294_s6, 4  ;;  %s178_s7 = int_to_ptr.vmem [resolvable:$true] %s177_s7 }
  0xc3   :  { %s264_s3 = scalar_lea.vmem %s178_s7, 128  ;;  %p269_p11 = scmp.lt.s32.totalorder %s178_s7, %s178_s7 }
  0xc4   :  { %p265_p10 = scmp.ne.s32.totalorder %s178_s7, %s264_s3  ;;  %p270_p12 = scmp.lt.s32.totalorder %s264_s3, %s264_s3 }
  0xc6   :  { %p271_p13 = por %p270_p12, %p269_p11 }
  0xc8   :  { %p272_p0 = pnand %p271_p13, %p265_p10 }
 0x16f   :  { %v148_v27 = vpop.f32.mrf.mxu0 }
 0x170   :  { %v152_v28 = vadd.f32 %v148_v27, %v77_v26 }
 0x171   :  { %v216_v29 = vpop.f32.mrf.mxu0 }
 0x172   :  { %153 = vst.msk [vmem:[#allocation5] sm:$0xff] %vm50_vm0, %v152_v28 }
 0x173   :  { %275 = shalt.err (!%p272_p0)
}
 0x174   :  { %180 = dma.vmem_to_hbm [thread:$0]  %s178_s7, 128, %s348_s2, [#allocation4]  }
 0x175   :  { %286 = dma.done.wait [#allocation4], 128  }
 0x176   :  { %287 = vsyncadd [#allocation4], 4294967168 }
 0x177   :  { %288 = dma.done.wait [#allocation7], 16  }
 0x178   :  { %289 = vsyncadd [#allocation7], 4294967280 }
 0x179   :  { %201 = vsyncpa [#allocation3], 1 }
 0x17a   :  { %202 = vsyncpa [#allocation4], 1 }
 0x17b   :  { %203 = vsyncpa [#allocation7], 1 }

</bundles_post_ra>
